<compile_context>
chip_gen: v7x
topology: tpu7x:2x2x1
jax: 0.10.0
libtpu: 0.0.40
codegen_flags: <defaults>
</compile_context>

<pallas_src>
import jax
import jax.numpy as jnp
from jax.experimental import pallas as pl
from jax.experimental.pallas import tpu as pltpu


def _pick_hw_tile(hw, max_tile=4096):
    """Largest lane-aligned (multiple of 128) divisor of hw that is <= max_tile."""
    if hw <= max_tile:
        return hw
    for t in range(max_tile, 0, -128):
        if hw % t == 0:
            return t
    return hw  # fallback: single full-extent tile (always a legal block)


def _reg_l1_kernel(feat_ref, ind_ref, mask_ref, tgt_ref, loss_ref, pred_acc):
    t = pl.program_id(1)
    n_t = pl.num_programs(1)

    @pl.when(t == 0)
    def _():
        pred_acc[...] = jnp.zeros_like(pred_acc)

    feat = feat_ref[0]                # (C, THW) f32, lane-dense over HW
    ind = ind_ref[0]                  # (1, K)   i32, lane-dense over K
    thw = feat.shape[1]
    k = ind.shape[1]

    # One-hot over this HW tile: onehot[hw, j] = (t*THW + hw == ind[j]).
    hw_pos = jax.lax.broadcasted_iota(jnp.int32, (thw, k), 0) + t * thw
    onehot = (hw_pos == ind).astype(jnp.float32)              # (THW, K)

    # Partial gather on the MXU: (C, THW) @ (THW, K) -> (C, K).  Each target
    # row lives in exactly one HW tile, so summing partials yields the gather.
    pred_acc[0] += jax.lax.dot_general(
        feat, onehot, (((1,), (0,)), ((), ())),
        preferred_element_type=jnp.float32)

    @pl.when(t == n_t - 1)
    def _():
        # |pred*m - tgt*m| == |pred - tgt| * m  (m >= 0): one fewer multiply.
        diff = jnp.abs(pred_acc[...] - tgt_ref[...]) * mask_ref[...]   # (1,C,K)
        loss_ref[...] = jnp.sum(diff, axis=(1, 2), keepdims=True)      # (1,1,1)


def reg_l1_loss(output, mask, ind, target):
    """output: (B, C, H, W); mask: (B, K); ind: (B, K) int; target: (B, K, C)."""
    B, C, H, W = output.shape
    K = ind.shape[1]
    HW = H * W

    feat = output.reshape(B, C, HW).astype(jnp.float32)              # free NCHW view
    tgt_t = jnp.transpose(target, (0, 2, 1)).astype(jnp.float32)     # (B, C, K), tiny
    mask_f = mask.astype(jnp.float32).reshape(B, 1, K)
    ind_i = ind.astype(jnp.int32).reshape(B, 1, K)

    thw = _pick_hw_tile(HW)
    n_hw = HW // thw

    loss_b = pl.pallas_call(
        _reg_l1_kernel,
        out_shape=jax.ShapeDtypeStruct((B, 1, 1), jnp.float32),
        grid_spec=pltpu.PrefetchScalarGridSpec(
            num_scalar_prefetch=0,
            grid=(B, n_hw),
            in_specs=[
                pl.BlockSpec((1, C, thw), lambda b, t: (b, 0, t)),   # feat (C, THW)
                pl.BlockSpec((1, 1, K), lambda b, t: (b, 0, 0)),     # ind
                pl.BlockSpec((1, 1, K), lambda b, t: (b, 0, 0)),     # mask
                pl.BlockSpec((1, C, K), lambda b, t: (b, 0, 0)),     # target^T
            ],
            out_specs=pl.BlockSpec((1, 1, 1), lambda b, t: (b, 0, 0)),
            scratch_shapes=[
                pltpu.VMEM((1, C, K), jnp.float32),                  # pred accumulator
            ],
        ),
        compiler_params=pltpu.CompilerParams(
            dimension_semantics=("parallel", "arbitrary"),
            vmem_limit_bytes=32 * 1024 * 1024),
    )(feat, ind_i, mask_f, tgt_t)

    # Tiny final reduction + normalization (B scalars; denominator needs no kernel).
    num = jnp.sum(loss_b)
    den = jnp.sum(mask_f) * jnp.float32(C) + jnp.float32(1e-4)
    return num / den


def _reference(output, mask, ind, target):
    B, C, H, W = output.shape
    feat = jnp.transpose(output, (0, 2, 3, 1)).reshape(B, H * W, C)
    pred = jnp.take_along_axis(feat, ind[:, :, None].astype(jnp.int32), axis=1)
    m = mask[:, :, None].astype(jnp.float32) * jnp.ones_like(pred)
    loss = jnp.sum(jnp.abs(pred * m - target * m))
    return loss / (jnp.sum(m) + 1e-4)


if __name__ == "__main__":
    B, C, H, W, K = 2, 4, 16, 16, 8
    key = jax.random.PRNGKey(0)
    k1, k2, k3, k4 = jax.random.split(key, 4)

    output = jax.random.normal(k1, (B, C, H, W), dtype=jnp.float32)
    ind = jax.random.randint(k2, (B, K), 0, H * W, dtype=jnp.int32)
    mask = jax.random.bernoulli(k3, 0.7, (B, K)).astype(jnp.float32)
    target = jax.random.normal(k4, (B, K, C), dtype=jnp.float32)

    loss = reg_l1_loss(output, mask, ind, target)
    loss = jax.block_until_ready(loss)

    ref = _reference(output, mask, ind, target)
    assert jnp.allclose(loss, ref, rtol=1e-5, atol=1e-5), (loss, ref)

    print("KERNEL_OK")
</pallas_src>

<mosaic_0001>
module attributes {stable_mosaic.version = 11 : i64} {
  func.func @_reg_l1_kernel(%arg0: i32, %arg1: i32, %arg2: memref<1x4x256xf32, #tpu.memory_space<vmem>>, %arg3: memref<1x1x8xi32, #tpu.memory_space<vmem>>, %arg4: memref<1x1x8xf32, #tpu.memory_space<vmem>>, %arg5: memref<1x4x8xf32, #tpu.memory_space<vmem>>, %arg6: memref<1x1x1xf32, #tpu.memory_space<vmem>>, %arg7: memref<1x4x8xf32, #tpu.memory_space<vmem>>) attributes {dimension_semantics = [#tpu.dimension_semantics<parallel>, #tpu.dimension_semantics<arbitrary>], iteration_bounds = array<i64: 2, 1>, scalar_prefetch = 0 : i64, scratch_operands = 1 : i64, tpu.core_type = #tpu.core_type<tc>, window_params = [{transform_indices = @transform_0, window_bounds = array<i64: 1, 4, 256>}, {transform_indices = @transform_1, window_bounds = array<i64: 1, 1, 8>}, {transform_indices = @transform_2, window_bounds = array<i64: 1, 1, 8>}, {transform_indices = @transform_3, window_bounds = array<i64: 1, 4, 8>}, {transform_indices = @transform_4, window_bounds = array<i64: 1, 1, 1>}]} {
    %c0_i32 = arith.constant 0 : i32
    %0 = arith.cmpi eq, %arg1, %c0_i32 : i32
    %1 = arith.extui %0 : i1 to i32
    %c0_i32_0 = arith.constant 0 : i32
    %2 = arith.cmpi ne, %1, %c0_i32_0 : i32
    scf.if %2 {
      %cst_14 = arith.constant 0.000000e+00 : f32
      %25 = vector.broadcast %cst_14 : f32 to vector<1x4x8xf32>
      %c0_15 = arith.constant 0 : index
      %c0_16 = arith.constant 0 : index
      %c0_17 = arith.constant 0 : index
      %26 = vector.load %arg7[%c0_15, %c0_16, %c0_17] : memref<1x4x8xf32, #tpu.memory_space<vmem>>, vector<1x4x8xf32>
      tpu.vector_store %arg7[%c0_15, %c0_16, %c0_17], %25 {strides = array<i32>} : memref<1x4x8xf32, #tpu.memory_space<vmem>>, vector<1x4x8xf32>,
    } else {
    }
    %c0 = arith.constant 0 : index
    %c0_1 = arith.constant 0 : index
    %c0_2 = arith.constant 0 : index
    %3 = vector.load %arg2[%c0, %c0_1, %c0_2] : memref<1x4x256xf32, #tpu.memory_space<vmem>>, vector<1x4x256xf32>
    %4 = vector.shape_cast %3 : vector<1x4x256xf32> to vector<4x256xf32>
    %c0_3 = arith.constant 0 : index
    %c0_4 = arith.constant 0 : index
    %c0_5 = arith.constant 0 : index
    %5 = vector.load %arg3[%c0_3, %c0_4, %c0_5] : memref<1x1x8xi32, #tpu.memory_space<vmem>>, vector<1x1x8xi32>
    %6 = vector.shape_cast %5 : vector<1x1x8xi32> to vector<1x8xi32>
    %7 = tpu.iota {dimensions = array<i32: 0>} : vector<256x8xi32>
    %c256_i32 = arith.constant 256 : i32
    %8 = arith.muli %arg1, %c256_i32 : i32
    %9 = vector.broadcast %8 : i32 to vector<256x8xi32>
    %10 = arith.addi %7, %9 : vector<256x8xi32>
    %11 = vector.broadcast %6 : vector<1x8xi32> to vector<256x8xi32>
    %12 = arith.cmpi eq, %10, %11 : vector<256x8xi32>
    %13 = arith.extui %12 : vector<256x8xi1> to vector<256x8xi32>
    %14 = arith.sitofp %13 : vector<256x8xi32> to vector<256x8xf32>
    %c0_6 = arith.constant 0 : index
    %c0_7 = arith.constant 0 : index
    %c0_8 = arith.constant 0 : index
    %15 = vector.load %arg7[%c0_6, %c0_7, %c0_8] : memref<1x4x8xf32, #tpu.memory_space<vmem>>, vector<1x4x8xf32>
    %16 = vector.shape_cast %15 : vector<1x4x8xf32> to vector<4x8xf32>
    %cst = arith.constant dense<0.000000e+00> : vector<4x8xf32>
    %17 = tpu.matmul %4, %14, %cst {dimension_numbers = #tpu.dot_dimension_numbers<[1], [0], [0], [1], [0, 0, 1, 1], [], []>} : vector<4x256xf32>, vector<256x8xf32>, vector<4x8xf32> -> vector<4x8xf32>
    %18 = arith.addf %16, %17 : vector<4x8xf32>
    %c0_9 = arith.constant 0 : index
    %c0_10 = arith.constant 0 : index
    %c0_11 = arith.constant 0 : index
    %19 = vector.load %arg7[%c0_9, %c0_10, %c0_11] : memref<1x4x8xf32, #tpu.memory_space<vmem>>, vector<1x4x8xf32>
    %20 = vector.shape_cast %19 : vector<1x4x8xf32> to vector<4x8xf32>
    %21 = vector.shape_cast %18 : vector<4x8xf32> to vector<1x4x8xf32>
    tpu.vector_store %arg7[%c0_9, %c0_10, %c0_11], %21 {strides = array<i32>} : memref<1x4x8xf32, #tpu.memory_space<vmem>>, vector<1x4x8xf32>,
    %c0_i32_12 = arith.constant 0 : i32
    %22 = arith.cmpi eq, %arg1, %c0_i32_12 : i32
    %23 = arith.extui %22 : i1 to i32
    %c0_i32_13 = arith.constant 0 : i32
    %24 = arith.cmpi ne, %23, %c0_i32_13 : i32
    scf.if %24 {
      %c0_14 = arith.constant 0 : index
      %c0_15 = arith.constant 0 : index
      %c0_16 = arith.constant 0 : index
      %25 = vector.load %arg7[%c0_14, %c0_15, %c0_16] : memref<1x4x8xf32, #tpu.memory_space<vmem>>, vector<1x4x8xf32>
      %c0_17 = arith.constant 0 : index
      %c0_18 = arith.constant 0 : index
      %c0_19 = arith.constant 0 : index
      %26 = vector.load %arg5[%c0_17, %c0_18, %c0_19] : memref<1x4x8xf32, #tpu.memory_space<vmem>>, vector<1x4x8xf32>
      %27 = arith.subf %25, %26 : vector<1x4x8xf32>
      %28 = math.absf %27 : vector<1x4x8xf32>
      %c0_20 = arith.constant 0 : index
      %c0_21 = arith.constant 0 : index
      %c0_22 = arith.constant 0 : index
      %29 = vector.load %arg4[%c0_20, %c0_21, %c0_22] : memref<1x1x8xf32, #tpu.memory_space<vmem>>, vector<1x1x8xf32>
      %30 = vector.broadcast %29 : vector<1x1x8xf32> to vector<1x4x8xf32>
      %31 = arith.mulf %28, %30 : vector<1x4x8xf32>
      %cst_23 = arith.constant dense<0.000000e+00> : vector<1xf32>
      %32 = vector.multi_reduction <add>, %31, %cst_23 [1, 2] : vector<1x4x8xf32> to vector<1xf32>
      %33 = vector.shape_cast %32 : vector<1xf32> to vector<1x1x1xf32>
      %c0_24 = arith.constant 0 : index
      %c0_25 = arith.constant 0 : index
      %c0_26 = arith.constant 0 : index
      %34 = vector.load %arg6[%c0_24, %c0_25, %c0_26] : memref<1x1x1xf32, #tpu.memory_space<vmem>>, vector<1x1x1xf32>
      tpu.vector_store %arg6[%c0_24, %c0_25, %c0_26], %33 {strides = array<i32>} : memref<1x1x1xf32, #tpu.memory_space<vmem>>, vector<1x1x1xf32>,
    } else {
    }
    return
  }
  func.func @transform_0(%arg0: i32, %arg1: i32) -> (i32, i32, i32) {
    %c0_i32 = arith.constant 0 : i32
    %c0_i32_0 = arith.constant 0 : i32
    return %arg0, %c0_i32, %arg1 : i32, i32, i32
  }
  func.func @transform_1(%arg0: i32, %arg1: i32) -> (i32, i32, i32) {
    %c0_i32 = arith.constant 0 : i32
    %c0_i32_0 = arith.constant 0 : i32
    %c0_i32_1 = arith.constant 0 : i32
    return %arg0, %c0_i32, %c0_i32_0 : i32, i32, i32
  }
  func.func @transform_2(%arg0: i32, %arg1: i32) -> (i32, i32, i32) {
    %c0_i32 = arith.constant 0 : i32
    %c0_i32_0 = arith.constant 0 : i32
    %c0_i32_1 = arith.constant 0 : i32
    return %arg0, %c0_i32, %c0_i32_0 : i32, i32, i32
  }
  func.func @transform_3(%arg0: i32, %arg1: i32) -> (i32, i32, i32) {
    %c0_i32 = arith.constant 0 : i32
    %c0_i32_0 = arith.constant 0 : i32
    %c0_i32_1 = arith.constant 0 : i32
    return %arg0, %c0_i32, %c0_i32_0 : i32, i32, i32
  }
  func.func @transform_4(%arg0: i32, %arg1: i32) -> (i32, i32, i32) {
    %c0_i32 = arith.constant 0 : i32
    %c0_i32_0 = arith.constant 0 : i32
    %c0_i32_1 = arith.constant 0 : i32
    return %arg0, %c0_i32, %c0_i32_0 : i32, i32, i32
  }
}

</mosaic_0001>

<bundles_post_ra>
// kernel: tpu_custom_call.1
= control target key start
LH: loop header
LB: loop body
LE: loop exit
PB: predicated region body
PF: predicated region fallthrough
CT: control target
= control target key end

     0   :  { %9 = vsyncpa [#allocation4], 0  ;;  %s1313_s0 = inlined_call_operand.hbm [shape: f32[2,4,256], index: 0, kind: input, shape index: {}]   ;;  %s1314_s1 = inlined_call_operand.vmem [shape: s32[2,1,8], index: 1, kind: input, shape index: {}]   ;;  %s1315_s2 = inlined_call_operand.hbm [shape: f32[2,1,8], index: 2, kind: input, shape index: {}]   ;;  %s1316_s3 = inlined_call_operand.vmem [shape: f32[2,4,8], index: 3, kind: input, shape index: {}]   ;;  %s1317_s4 = inlined_call_operand.vmem [shape: f32[2,1,1], index: 4, kind: output, shape index: {}]  }
   0x1   :  { %11 = vsyncpa [#allocation4 + $0x1], 0 }
   0x2   :  { %12 = vsyncpa [#allocation6], 0 }
   0x3   :  { %14 = vsyncpa [#allocation6 + $0x1], 0  ;;  %s1038_s15 = smov 0   ;;  %s1040_s16 = smov 0  }
   0x4   :  { %s1042_s17 = smov 0   ;;  %s1044_s18 = smov 0  }
   0x5   :  { %s1046_s19 = smov 0   ;;  %s1048_s20 = smov 0  }
   0x6 LB: > { %s683_s21 = sadd.s32 4294967295, %s1007_s20   ;;  %s32_s22 = sadd.s32 1, %s1003_s19  ;;  %s1007_s20 = sphi %s1048_s20, %s20_s20   ;;  %s1003_s19 = sphi %s1046_s19, %s1331_s19   ;;  %s999_s18 = sphi %s1044_s18, %s1330_s18   ;;  %s995_s17 = sphi %s1042_s17, %s1329_s17   ;;  %s991_s16 = sphi %s1040_s16, %s1328_s16   ;;  %s987_s15 = sphi %s1038_s15, %s1327_s15  }
   0x7   : > { %p34_p0 = scmp.ge.s32.totalorder %s32_s22, 2  ;;  %s41_s23 = sadd.s32 1, %s995_s17 }
   0x8   : > { %p48_p1 = scmp.ne.s32.totalorder %s995_s17, %s991_s16  ;;  %p49_p2 = scmp.eq.s32.totalorder %s1007_s20, 0 }
   0x9   : > { %s1333_s22 = smov (%p34_p0, %s32_s22), 0  ;;  %p54_p4 = scmp.ne.s32.totalorder %s991_s16, %s987_s15 }
   0xa   : > { %p1074_p3 = por %p49_p2, %p48_p1  ;;  %s36_s25 = ssub.s32 %s1003_s19, %s1333_s22 }
   0xb   : > { %p55_p5 = scmp.eq.s32.totalorder %s683_s21, 0  ;;  %p39_p6 = scmp.eq.s32.totalorder %s36_s25, 0 }
   0xc   : > { %p841_p8 = scmp.lt.s32.totalorder %s1007_s20, 2  ;;  %s1090_s28 = sand.u32 1, %s995_s17  }
   0xd   : > { %p1081_p7 = por %p55_p5, %p54_p4  ;;  %s762_s29 = sshll.u32 %s1003_s19, 7 }
   0xe   : > { %s1087_s27 = scalar_select %p39_p6, %s995_s17, %s41_s23  }
   0xf   : > { %s1320_s26 = scalar_select %p1081_p7, 1, 0 }
  0x10   : > { %s687_s30 = sshll.u32 %s1090_s28, 3  ;;  %s1097_s7 = scalar_lea.hbm %s1313_s0, %s762_s29 }
  0x11   : > { %s186_s8 = scalar_lea.vmem [#allocation3], %s687_s30  ;;  %p1101_p9 = pnand %p841_p8, %p1074_p3 }
  0x12   : > { %s196_s9 = sshll.u32 %s186_s8, 4  ;;  %s183_s11 = scalar_lea.sflag [#allocation4], %s1090_s28  ;;  %s1105_s9 = int_to_ptr.vmem [resolvable:$true] %s196_s9 }
  0x13   : > { %s893_s12 = scalar_lea.hbm %s1097_s7, 128  ;;  %p895_p13 = pneg %p1101_p9 }
  0x14   : > { %p894_p12 = scmp.ne.s32.totalorder %s1097_s7, %s893_s12  ;;  %s898_s15 = scalar_lea.hbm %s1313_s0, 256 }
  0x15   : > { %p899_p2 = scmp.lt.u32.totalorder %s1097_s7, %s1313_s0  ;;  %p900_p3 = scmp.lt.u32.totalorder %s898_s15, %s893_s12 }
  0x16   : > { %p896_p0 = pnand %p895_p13, %p894_p12  ;;  %p902_p5 = scmp.lt.u32.totalorder %s893_s12, %s1097_s7 }
  0x17   : > { %p901_p4 = por %p900_p3, %p899_p2 }
  0x18   : > { %p897_p1 = pneg %p896_p0 }
  0x19   : > { %p903_p6 = por %p902_p5, %p901_p4 }
  0x1b   : > { %p904_p8 = pnand %p903_p6, %p897_p1 }
  0x1d   : > { %907 = shalt.err (!%p904_p8)
}
  0x1e   : > { %s908_s24 = scalar_lea.vmem %s1105_s9, 128  ;;  %s1009_s25 = smov [#allocation3]  }
  0x1f   : > { %p909_p12 = scmp.ne.s32.totalorder %s1105_s9, %s908_s24  ;;  %s913_s29 = sshll.u32 %s1009_s25, 4  ;;  %s914_s29 = int_to_ptr.vmem [resolvable:$false] %s913_s29 }
  0x20   : > { %s915_s30 = scalar_lea.vmem %s914_s29, 256  ;;  %p916_p11 = scmp.lt.s32.totalorder %s1105_s9, %s914_s29 }
  0x21   : > { %p911_p0 = pnand %p909_p12, %p895_p13  ;;  %p917_p2 = scmp.lt.s32.totalorder %s915_s30, %s908_s24 }
  0x23   : > { %p912_p10 = pneg %p911_p0  ;;  %p918_p3 = por %p917_p2, %p916_p11 }
  0x25   : > { %p919_p4 = pnand %p918_p3, %p912_p10 }
  0x27   : > { %922 = shalt.err (!%p919_p4)
}
  0x28   : > { %837 = dma.hbm_to_vmem [thread:$0]  (!%p1101_p9), %s1097_s7, 128, %s1105_s9, %s183_s11  }
  0x29   : > { %p1322_p1 = scmp.lt.s32.totalorder %s1007_s20, 3  ;;  %p1323_p5 = scmp.ge.s32.totalorder %s1007_s20, 1 }
  0x2a   : > { %s690_s6 = sshll.u32 %s1003_s19, 4  ;;  %s212_s14 = scalar_lea.vmem [#allocation5], %s1090_s28 }
  0x2b   : > { %p1139_p6 = pnand %p1323_p5, %p1322_p1  ;;  %s1147_s13 = scalar_lea.hbm %s1315_s2, %s690_s6 }
  0x2c   : > { %s219_s15 = sshll.u32 %s212_s14, 4  ;;  %s210_s7 = scalar_lea.sflag [#allocation6], %s1090_s28  ;;  %s220_s15 = int_to_ptr.vmem [resolvable:$true] %s219_s15 }
  0x2d   : > { %s1324_s5 = scalar_select %p1139_p6, 1, 0 }
  0x2e   : > { %s923_s9 = scalar_lea.hbm %s1147_s13, 16  ;;  %s928_s23 = scalar_lea.hbm %s1315_s2, 32 }
  0x2f   : > { %p924_p10 = scmp.ne.s32.totalorder %s1147_s13, %s923_s9  ;;  %p929_p12 = scmp.lt.u32.totalorder %s1147_s13, %s1315_s2 }
  0x30   : > { %p930_p0 = scmp.lt.u32.totalorder %s928_s23, %s923_s9  ;;  %p932_p3 = scmp.lt.u32.totalorder %s923_s9, %s1147_s13 }
  0x31   : > { %p926_p11 = pnand %p924_p10, %p895_p13 }
  0x32   : > { %p931_p2 = por %p930_p0, %p929_p12 }
  0x33   : > { %p927_p8 = pneg %p926_p11 }
  0x34   : > { %p933_p4 = por %p932_p3, %p931_p2 }
  0x36   : > { %p934_p1 = pnand %p933_p4, %p927_p8 }
  0x38   : > { %937 = shalt.err (!%p934_p1)
}
  0x39   : > { %s938_s28 = scalar_lea.vmem %s220_s15, 16  ;;  %s1010_s29 = smov [#allocation5]  }
  0x3a   : > { %p939_p5 = scmp.ne.s32.totalorder %s220_s15, %s938_s28  ;;  %s943_s30 = sshll.u32 %s1010_s29, 4  ;;  %s944_s30 = int_to_ptr.vmem [resolvable:$false] %s943_s30 }
  0x3b   : > { %s945_s6 = scalar_lea.vmem %s944_s30, 32  ;;  %p946_p7 = scmp.lt.s32.totalorder %s220_s15, %s944_s30 }
  0x3c   : > { %p941_p10 = pnand %p939_p5, %p895_p13  ;;  %p947_p6 = scmp.lt.s32.totalorder %s945_s6, %s938_s28 }
  0x3e   : > { %p942_p11 = pneg %p941_p10  ;;  %p948_p0 = por %p947_p6, %p946_p7 }
  0x40   : > { %p949_p12 = pnand %p948_p0, %p942_p11 }
  0x42   : > { %952 = shalt.err (!%p949_p12)
}
  0x43   : > { %840 = dma.hbm_to_vmem [thread:$0]  (!%p1101_p9), %s1147_s13, 16, %s220_s15, %s210_s7  }
  0x44   : > { %p1325_p8 = scmp.ne.s32.totalorder %s1324_s5, 0 }
  0x45   : > { %s1173_s8 = sand.u32 (!%p1325_p8), 1, %s991_s16   ;;  %p1326_p7 = scmp.ne.s32.totalorder (!%p1325_p8), %s1320_s26, 0 }
  0x46   : > { %235 = sbr.rel (%p1325_p8) target bundleno = 508 (0x1fc), region = 36  ;;  %s692_s12 = sshll.u32 (!%p1325_p8), %s1173_s8, 3 }
  0x47   : > { %s238_s14 = scalar_lea.sflag (!%p1325_p8), [#allocation4], %s1173_s8  ;;  %s1177_s9 = scalar_lea.vmem (!%p1325_p8), [#allocation3], %s692_s12 }
  0x4d   : > { %978 = dma.done.wait (%p1326_p7), %s238_s14, 128  }
  0x4e   : > { %980 = vsyncadd (%p1326_p7), %s238_s14, 4294967168  ;;  %s247_s10 = scalar_lea.sflag [#allocation6], %s1173_s8  ;;  %s249_s5 = scalar_lea.vmem [#allocation5], %s1173_s8 }
  0x4f   : > { %982 = dma.done.wait (%p1326_p7), %s247_s10, 16  }
  0x50   : > { %984 = vsyncadd (%p1326_p7), %s247_s10, 4294967280  ;;  %p284_p9 = scmp.lt.s32.totalorder %s999_s18, 1  ;;  %v302_v0 = vlaneseq  ;;  %v1011_v14 = vmov 1.0|1.0   ;;  %v300_v21 = vld [vmem:[%s1177_s9] sm:$0xff]  ;;  %v1012_v37 = vmov 0.0  }
  0x51   : > { %v471_v26 = vcombine.high %v300_v21, %v300_v21  ;;  %v759_v46 = vld [vmem:[%s249_s5] ss:$0 sm:$0xff] }
  0x52   : > { %s1335_s18 = smov (!%p284_p9, %s999_s18), 1  ;;  %v1193_v1 = vshrl.u32 %v302_v0, 7 }
  0x53   : > { %s286_s7 = scalar_lea.vmem %s1314_s1, %s1335_s18  ;;  %537 = vmatprep.mubr.f32.mxu0 %v471_v26  ;;  %s693_s26 = sshll.u32 %s1335_s18, 2 }
  0x54   : > { %v319_v2 = vadd.s32 128, %v1193_v1  ;;  %v320_v3 = vadd.s32 136, %v1193_v1  ;;  %v304_v4 = vadd.s32 8, %v1193_v1  ;;  %v321_v5 = vadd.s32 144, %v1193_v1  ;;  %v1208_v11 = vld [vmem:[%s286_s7] ss:$0 sm:$0xff]  ;;  %s290_s23 = scalar_lea.vmem %s1316_s3, %s693_s26  ;;  %s293_s28 = scalar_lea.vmem %s1317_s4, %s1335_s18 }
  0x55   : > { %v322_v6 = vadd.s32 152, %v1193_v1  ;;  %v305_v7 = vadd.s32 16, %v1193_v1  ;;  %v306_v8 = vadd.s32 24, %v1193_v1  ;;  %v323_v9 = vadd.s32 160, %v1193_v1  ;;  %v550_v43 = vld [vmem:[%s290_s23] sm:$0xf] }
  0x56   : > { %v324_v10 = vadd.s32 168, %v1193_v1  ;;  %v307_v12 = vadd.s32 32, %v1193_v1  ;;  %v308_v13 = vadd.s32 40, %v1193_v1  ;;  %vm389_vm0 = vcmp.eq.s32.totalorder %v319_v2, %v1208_v11 }
  0x57   : > { %vm390_vm1 = vcmp.eq.s32.totalorder %v320_v3, %v1208_v11  ;;  %vm373_vm2 = vcmp.eq.s32.totalorder %v1193_v1, %v1208_v11  ;;  %vm374_vm3 = vcmp.eq.s32.totalorder %v304_v4, %v1208_v11  ;;  %vm391_vm5 = vcmp.eq.s32.totalorder %v321_v5, %v1208_v11 }
  0x58   : > { %vm798_vm4 = vmpackc.low %vm390_vm1, %vm389_vm0  ;;  %vm392_vm6 = vcmp.eq.s32.totalorder %v322_v6, %v1208_v11  ;;  %vm375_vm7 = vcmp.eq.s32.totalorder %v305_v7, %v1208_v11  ;;  %vm376_vm8 = vcmp.eq.s32.totalorder %v306_v8, %v1208_v11  ;;  %vm393_vm10 = vcmp.eq.s32.totalorder %v323_v9, %v1208_v11 }
  0x59   : > { %799 = vmatprep.subr.msk.bf16.mxu0 %vm798_vm4, %v1011_v14  ;;  %vm800_vm9 = vmpackc.low %vm374_vm3, %vm373_vm2  ;;  %vm394_vm11 = vcmp.eq.s32.totalorder %v324_v10, %v1208_v11  ;;  %v325_v15 = vadd.s32 176, %v1193_v1  ;;  %v326_v16 = vadd.s32 184, %v1193_v1  ;;  %v309_v17 = vadd.s32 48, %v1193_v1 }
  0x5a   : > { %801 = vmatpush3.bf16.msk.msra.mxu0 %vm800_vm9, %v1011_v14  ;;  %vm802_vm12 = vmpackc.low %vm392_vm6, %vm391_vm5  ;;  %vm377_vm15 = vcmp.eq.s32.totalorder %v307_v12, %v1208_v11  ;;  %vm378_vm0 = vcmp.eq.s32.totalorder %v308_v13, %v1208_v11  ;;  %v310_v18 = vadd.s32 56, %v1193_v1  ;;  %v327_v19 = vadd.s32 192, %v1193_v1 }
  0x5b   : > { %803 = vmatprep.subr.msk.bf16.mxu0 %vm802_vm12, %v1011_v14  ;;  %vm804_vm13 = vmpackc.low %vm376_vm8, %vm375_vm7  ;;  %vm395_vm1 = vcmp.eq.s32.totalorder %v325_v15, %v1208_v11  ;;  %vm396_vm2 = vcmp.eq.s32.totalorder %v326_v16, %v1208_v11  ;;  %v328_v20 = vadd.s32 200, %v1193_v1  ;;  %vm379_vm4 = vcmp.eq.s32.totalorder %v309_v17, %v1208_v11 }
  0x5c   : > { %vm806_vm14 = vmpackc.low %vm394_vm11, %vm393_vm10  ;;  %vm380_vm6 = vcmp.eq.s32.totalorder %v310_v18, %v1208_v11  ;;  %vm397_vm7 = vcmp.eq.s32.totalorder %v327_v19, %v1208_v11  ;;  %v311_v22 = vadd.s32 64, %v1193_v1  ;;  %v312_v23 = vadd.s32 72, %v1193_v1 }
  0x5d   : > { %vm808_vm3 = vmpackc.low %vm378_vm0, %vm377_vm15  ;;  %vm398_vm8 = vcmp.eq.s32.totalorder %v328_v20, %v1208_v11  ;;  %v329_v24 = vadd.s32 208, %v1193_v1  ;;  %v330_v25 = vadd.s32 216, %v1193_v1  ;;  %v313_v27 = vadd.s32 80, %v1193_v1 }
  0x5e   : > { %805 = vmatpush3.bf16.msk.msra.mxu0 %vm804_vm13, %v1011_v14  ;;  %vm810_vm5 = vmpackc.low %vm396_vm2, %vm395_vm1  ;;  %vm381_vm11 = vcmp.eq.s32.totalorder %v311_v22, %v1208_v11  ;;  %vm382_vm12 = vcmp.eq.s32.totalorder %v312_v23, %v1208_v11  ;;  %v314_v28 = vadd.s32 88, %v1193_v1  ;;  %v331_v29 = vadd.s32 224, %v1193_v1 }
  0x5f   : > { %807 = vmatprep.subr.msk.bf16.mxu0 %vm806_vm14, %v1011_v14  ;;  %vm812_vm9 = vmpackc.low %vm380_vm6, %vm379_vm4  ;;  %vm399_vm13 = vcmp.eq.s32.totalorder %v329_v24, %v1208_v11  ;;  %vm400_vm14 = vcmp.eq.s32.totalorder %v330_v25, %v1208_v11  ;;  %v332_v30 = vadd.s32 232, %v1193_v1  ;;  %vm383_vm1 = vcmp.eq.s32.totalorder %v313_v27, %v1208_v11 }
  0x60   : > { %vm814_vm10 = vmpackc.low %vm398_vm8, %vm397_vm7  ;;  %vm384_vm2 = vcmp.eq.s32.totalorder %v314_v28, %v1208_v11  ;;  %v315_v31 = vadd.s32 96, %v1193_v1  ;;  %v316_v32 = vadd.s32 104, %v1193_v1  ;;  %v333_v33 = vadd.s32 240, %v1193_v1 }
  0x61   : > { %vm816_vm15 = vmpackc.low %vm382_vm12, %vm381_vm11  ;;  %vm402_vm4 = vcmp.eq.s32.totalorder %v332_v30, %v1208_v11  ;;  %v334_v34 = vadd.s32 248, %v1193_v1  ;;  %v317_v35 = vadd.s32 112, %v1193_v1  ;;  %v318_v36 = vadd.s32 120, %v1193_v1 }
  0x62   : > { %809 = vmatpush3.bf16.msk.msra.mxu0 %vm808_vm3, %v1011_v14  ;;  %vm818_vm0 = vmpackc.low %vm400_vm14, %vm399_vm13  ;;  %vm401_vm3 = vcmp.eq.s32.totalorder %v331_v29, %v1208_v11  ;;  %vm385_vm7 = vcmp.eq.s32.totalorder %v315_v31, %v1208_v11  ;;  %vm386_vm8 = vcmp.eq.s32.totalorder %v316_v32, %v1208_v11 }
  0x63   : > { %811 = vmatprep.subr.msk.bf16.mxu0 %vm810_vm5, %v1011_v14  ;;  %vm820_vm5 = vmpackc.low %vm384_vm2, %vm383_vm1  ;;  %vm387_vm13 = vcmp.eq.s32.totalorder %v317_v35, %v1208_v11  ;;  %vm388_vm14 = vcmp.eq.s32.totalorder %v318_v36, %v1208_v11  ;;  %vm570_vm1 = vcmask 0  }
  0x64   : > { %vm822_vm6 = vmpackc.low %vm402_vm4, %vm401_vm3 }
  0x65   : > { %vm824_vm11 = vmpackc.low %vm386_vm8, %vm385_vm7 }
  0x66   : > { %813 = vmatpush3.bf16.msk.msra.mxu0 %vm812_vm9, %v1011_v14  ;;  %vm403_vm9 = vcmp.eq.s32.totalorder %v333_v33, %v1208_v11 }
  0x67   : > { %815 = vmatprep.subr.msk.bf16.mxu0 %vm814_vm10, %v1011_v14  ;;  %vm404_vm10 = vcmp.eq.s32.totalorder %v334_v34, %v1208_v11 }
  0x68   : > { %vm826_vm12 = vmpackc.low %vm404_vm10, %vm403_vm9 }
  0x6a   : > { %817 = vmatpush3.bf16.msk.msra.mxu0 %vm816_vm15, %v1011_v14  ;;  %vm828_vm15 = vmpackc.low %vm388_vm14, %vm387_vm13 }
  0x6b   : > { %819 = vmatprep.subr.msk.bf16.mxu0 %vm818_vm0, %v1011_v14  ;;  %vm298_vm0 = vcmask 60416  }
  0x6c   : > { %299 = vst.msk [vmem:[#allocation2] sm:$0xf] %vm298_vm0, %v1012_v37 }
  0x6e   : > { %821 = vmatpush3.bf16.msk.msra.mxu0 %vm820_vm5, %v1011_v14 }
  0x6f   : > { %823 = vmatprep.subr.msk.bf16.mxu0 %vm822_vm6, %v1011_v14 }
  0x72   : > { %825 = vmatpush3.bf16.msk.msra.mxu0 %vm824_vm11, %v1011_v14 }
  0x73   : > { %827 = vmatprep.subr.msk.bf16.mxu0 %vm826_vm12, %v1011_v14  ;;  %v469_v40 = vld [vmem:[#allocation2] sm:$0xf] }
  0x76   : > { %829 = vmatpush3.bf16.msk.msra.mxu0 %vm828_vm15, %v1011_v14 }
  0x79   : > { %538 = vmatmul.mubr.f32.vlgmr.msra.gmra.mrb[0].mxu0 %v300_v21 }
 0x14c   : > { %v795_v38 = vpop.f32.mrb[0].mxu0 }
 0x14d   : > { %v796_v39 = vpop.f32.mrb[1].mxu0 }
 0x14e   : > { %v797_v41 = vadd.f32 %v796_v39, %v795_v38 }
 0x150   : > { %v543_v42 = vadd.f32 %v797_v41, %v469_v40 }
 0x152   : > { %545 = vst.msk [vmem:[#allocation2] sm:$0xf] %vm298_vm0, %v543_v42 }
 0x159   : > { %v549_v44 = vld [vmem:[#allocation2] sm:$0xf] }
 0x15a   : > { %v551_v45 = vsub.f32 %v549_v44, %v550_v43 }
 0x15c   : > { %v552_v47 = vand.u32 2147483647, %v551_v45 }
 0x15e   : > { %v560_v48 = vmul.f32 %v759_v46, %v552_v47 }
 0x160   : > { %v561_v49 = vsel %vm298_vm0, %v560_v48, 0.0 }
 0x161   : > { %562 = vadd.xlane.f32.xlu0 %v561_v49 }
 0x1ee   : > { %v563_v50 = vpop.xlane.xlu0 %562 }
 0x1ef   : > { %v564_v51 = vrot.slane %v563_v50, 4 }
 0x1f1   : > { %v565_v52 = vadd.f32 %v564_v51, %v563_v50 }
 0x1f3   : > { %v566_v53 = vrot.slane %v565_v52, 2 }
 0x1f5   : > { %v567_v54 = vadd.f32 %v566_v53, %v565_v52 }
 0x1f7   : > { %v568_v55 = vrot.slane %v567_v54, 1 }
 0x1f9   : > { %v569_v56 = vadd.f32 %v568_v55, %v567_v54 }
 0x1fb   : > { %571 = vst.msk [vmem:[%s293_s28] sm:$0x1] %vm570_vm1, %v569_v56 }
 0x1fc PF: > { %s20_s20 = sadd.s32 1, %s1007_s20   ;;  %s1327_s15 = smov %s991_s16 }
 0x1fd   : > { %p17_p13 = scmp.ge.s32.totalorder %s20_s20, 4   ;;  %s1328_s16 = smov %s995_s17 }
 0x1fe   : > { %s1329_s17 = smov %s1087_s27  ;;  %s1330_s18 = smov %s1003_s19 }
 0x1ff   : > { %s1331_s19 = smov %s1333_s22  ;;  %19 = sbr.rel (!%p17_p13) target bundleno = 6 (0x6), region = 103 }
 0x206   :  { %589 = vsyncpa [#allocation4], 1 }
 0x207   :  { %591 = vsyncpa [#allocation4 + $0x1], 1 }
 0x208   :  { %592 = vsyncpa [#allocation6], 1 }
 0x209   :  { %594 = vsyncpa [#allocation6 + $0x1], 1 }

</bundles_post_ra>
